<compile_context>
chip_gen: v7x
topology: tpu7x:2x2x1
jax: 0.10.0
libtpu: 0.0.40
codegen_flags: <defaults>
</compile_context>

<pallas_src>
import functools

import jax
import jax.numpy as jnp
from jax.experimental import pallas as pl
from jax.experimental.pallas import tpu as pltpu


def _round_up(x, m):
    return (x + m - 1) // m * m


def _pad_to(a, shape):
    pads = [(0, s - d) for d, s in zip(a.shape, shape)]
    if any(p[1] for p in pads):
        return jnp.pad(a, pads)
    return a


def _ffn_kernel(x_ref, w1_ref, b1_ref, w2_ref, b2_ref, o_ref, acc_ref):
    # x_ref:  (tm, dim_p)      w1_ref: (dim_p, tff)   b1_ref: (1, tff)
    # w2_ref: (tff, dim_p)     b2_ref: (1, dim_p)
    # o_ref:  (tm, dim_p)      acc_ref: (tm, dim_p) f32 scratch (resident over k)
    k = pl.program_id(1)

    @pl.when(k == 0)
    def _init():
        acc_ref[...] = jnp.zeros_like(acc_ref)

    x = x_ref[...].astype(w1_ref.dtype)
    h = jnp.dot(x, w1_ref[...], preferred_element_type=jnp.float32)
    h = h + b1_ref[...]
    # Exact (erf-based) GELU, matching torch.nn.GELU() default.
    h = 0.5 * h * (1.0 + jax.lax.erf(h * jnp.float32(0.7071067811865476)))
    acc_ref[...] += jnp.dot(h.astype(w2_ref.dtype), w2_ref[...],
                            preferred_element_type=jnp.float32)

    @pl.when(k == pl.num_programs(1) - 1)
    def _finalize():
        o_ref[...] = (acc_ref[...] + b2_ref[...]).astype(o_ref.dtype)


def feed_forward(x, w1, b1, w2, b2, *, tm=256, tff=512, compute_dtype=None):
    """x: (B, N, dim). Returns (B, N, dim). compute_dtype optionally casts the
    MXU inputs (e.g. jnp.bfloat16 on v6e/v7x); accumulation stays f32."""
    B, N, dim = x.shape
    ff_dim = w1.shape[1]
    M = B * N

    # Lane-dense padded feature dims (multiples of 128); zero-padding is exact.
    dim_p = _round_up(dim, 128)
    tm_eff = min(tm, _round_up(M, 8))
    M_p = _round_up(M, tm_eff)
    tff_eff = min(tff, _round_up(ff_dim, 128))
    ff_p = _round_up(ff_dim, tff_eff)

    w_dtype = compute_dtype if compute_dtype is not None else w1.dtype

    x2d = _pad_to(x.reshape(M, dim), (M_p, dim_p))
    w1_p = _pad_to(w1.astype(w_dtype), (dim_p, ff_p))
    w2_p = _pad_to(w2.astype(w_dtype), (ff_p, dim_p))
    b1_p = _pad_to(b1.astype(jnp.float32).reshape(1, ff_dim), (1, ff_p))
    b2_p = _pad_to(b2.astype(jnp.float32).reshape(1, dim), (1, dim_p))

    grid = (M_p // tm_eff, ff_p // tff_eff)

    # Conservative (f32, double-buffered) VMEM estimate -> explicit scoped limit
    # with headroom, capped at 64 MiB so it is valid on v7x as well.
    est = 2 * (tm_eff * dim_p + dim_p * tff_eff + tff_eff
               + tff_eff * dim_p + dim_p + tm_eff * dim_p) * 4
    est += tm_eff * dim_p * 4  # accumulator scratch
    vmem_limit = min(64 * 1024 * 1024, max(int(est * 1.5), 16 * 1024 * 1024))

    itemsize = jnp.dtype(x.dtype).itemsize
    cost = pl.CostEstimate(
        flops=4 * M * dim * ff_dim,             # two matmuls, 2*M*K*N each
        transcendentals=M * ff_dim,             # erf on the hidden tensor
        bytes_accessed=(M * dim * 2 + dim * ff_dim * 2 + ff_dim + dim) * itemsize,
    )

    out = pl.pallas_call(
        _ffn_kernel,
        out_shape=jax.ShapeDtypeStruct((M_p, dim_p), x.dtype),
        grid_spec=pltpu.PrefetchScalarGridSpec(
            num_scalar_prefetch=0,
            grid=grid,
            in_specs=[
                pl.BlockSpec((tm_eff, dim_p), lambda i, k: (i, 0)),   # x row tile
                pl.BlockSpec((dim_p, tff_eff), lambda i, k: (0, k)),  # W1 k-tile
                pl.BlockSpec((1, tff_eff), lambda i, k: (0, k)),      # b1 k-tile
                pl.BlockSpec((tff_eff, dim_p), lambda i, k: (k, 0)),  # W2 k-tile
                pl.BlockSpec((1, dim_p), lambda i, k: (0, 0)),        # b2
            ],
            out_specs=pl.BlockSpec((tm_eff, dim_p), lambda i, k: (i, 0)),
            scratch_shapes=[pltpu.VMEM((tm_eff, dim_p), jnp.float32)],
        ),
        compiler_params=pltpu.CompilerParams(
            dimension_semantics=("parallel", "arbitrary"),
            vmem_limit_bytes=vmem_limit,
        ),
        cost_estimate=cost,
    )(x2d, w1_p, b1_p, w2_p, b2_p)

    return out[:M, :dim].reshape(B, N, dim)


def feed_forward_ref(x, w1, b1, w2, b2):
    h = jnp.einsum("bnd,df->bnf", x, w1) + b1
    h = 0.5 * h * (1.0 + jax.lax.erf(h * jnp.float32(0.7071067811865476)))
    return jnp.einsum("bnf,fd->bnd", h, w2) + b2


def _make_params(key, dim, ff_dim):
    kw1, kb1, kw2, kb2 = jax.random.split(key, 4)
    w1 = jax.random.normal(kw1, (dim, ff_dim), dtype=jnp.float32) * (1.0 / dim ** 0.5)
    b1 = jax.random.normal(kb1, (ff_dim,), dtype=jnp.float32) * 0.01
    w2 = jax.random.normal(kw2, (ff_dim, dim), dtype=jnp.float32) * (1.0 / ff_dim ** 0.5)
    b2 = jax.random.normal(kb2, (dim,), dtype=jnp.float32) * 0.01
    return w1, b1, w2, b2


if __name__ == "__main__":
    key = jax.random.PRNGKey(0)
    k1, k2, kp1, kp2 = jax.random.split(key, 4)

    # Test 1: aligned dims, multiple row tiles and multiple ff_dim reduction
    # tiles (exercises the accumulator init/finalize path).
    batch, seq, dim, ff_dim = 2, 64, 128, 256
    x = jax.random.normal(k1, (batch, seq, dim), dtype=jnp.float32)
    w1, b1, w2, b2 = _make_params(kp1, dim, ff_dim)
    fn = jax.jit(functools.partial(feed_forward, tm=64, tff=128))
    y = jax.block_until_ready(fn(x, w1, b1, w2, b2))
    y_ref = feed_forward_ref(x, w1, b1, w2, b2)
    assert y.shape == (batch, seq, dim)
    assert jnp.allclose(y, y_ref, atol=1e-5, rtol=1e-5), "mismatch vs reference (aligned)"

    # Test 2: toy unaligned dims (dim=32, ff_dim=64) -> exercises the
    # pad-to-lane-dense path.
    batch, seq, dim, ff_dim = 2, 8, 32, 64
    x = jax.random.normal(k2, (batch, seq, dim), dtype=jnp.float32)
    w1, b1, w2, b2 = _make_params(kp2, dim, ff_dim)
    fn2 = jax.jit(feed_forward)
    y = jax.block_until_ready(fn2(x, w1, b1, w2, b2))
    y_ref = feed_forward_ref(x, w1, b1, w2, b2)
    assert y.shape == (batch, seq, dim)
    assert jnp.allclose(y, y_ref, atol=1e-5, rtol=1e-5), "mismatch vs reference (padded)"

    # TODO(synk): Dropout with p>0 (training) would need pltpu.prng_seed /
    # prng_random_bits masking; module default p=0.0 is an identity, so omitted.

    print("KERNEL_OK")
</pallas_src>

<mosaic_0001>
module attributes {stable_mosaic.version = 11 : i64} {
  func.func @_ffn_kernel(%arg0: i32, %arg1: i32, %arg2: memref<64x128xf32, #tpu.memory_space<vmem>>, %arg3: memref<128x128xf32, #tpu.memory_space<vmem>>, %arg4: memref<1x128xf32, #tpu.memory_space<vmem>>, %arg5: memref<128x128xf32, #tpu.memory_space<vmem>>, %arg6: memref<1x128xf32, #tpu.memory_space<vmem>>, %arg7: memref<64x128xf32, #tpu.memory_space<vmem>>, %arg8: memref<64x128xf32, #tpu.memory_space<vmem>>) attributes {dimension_semantics = [#tpu.dimension_semantics<parallel>, #tpu.dimension_semantics<arbitrary>], iteration_bounds = array<i64: 2, 2>, scalar_prefetch = 0 : i64, scratch_operands = 1 : i64, tpu.core_type = #tpu.core_type<tc>, window_params = [{transform_indices = @transform_0, window_bounds = array<i64: 64, 128>}, {transform_indices = @transform_1, window_bounds = array<i64: 128, 128>}, {transform_indices = @transform_2, window_bounds = array<i64: 1, 128>}, {transform_indices = @transform_3, window_bounds = array<i64: 128, 128>}, {pipeline_mode = #tpu.pipeline_mode<synchronous>, transform_indices = @transform_4, window_bounds = array<i64: 1, 128>}, {transform_indices = @transform_5, window_bounds = array<i64: 64, 128>}]} {
    %c0_i32 = arith.constant 0 : i32
    %0 = arith.cmpi eq, %arg1, %c0_i32 : i32
    %1 = arith.extui %0 : i1 to i32
    %c0_i32_0 = arith.constant 0 : i32
    %2 = arith.cmpi ne, %1, %c0_i32_0 : i32
    scf.if %2 {
      %cst_17 = arith.constant 0.000000e+00 : f32
      %25 = vector.broadcast %cst_17 : f32 to vector<64x128xf32>
      %c0_18 = arith.constant 0 : index
      %c0_19 = arith.constant 0 : index
      %26 = vector.load %arg8[%c0_18, %c0_19] : memref<64x128xf32, #tpu.memory_space<vmem>>, vector<64x128xf32>
      tpu.vector_store %arg8[%c0_18, %c0_19], %25 {strides = array<i32>} : memref<64x128xf32, #tpu.memory_space<vmem>>, vector<64x128xf32>,
    } else {
    }
    %c0 = arith.constant 0 : index
    %c0_1 = arith.constant 0 : index
    %3 = vector.load %arg2[%c0, %c0_1] : memref<64x128xf32, #tpu.memory_space<vmem>>, vector<64x128xf32>
    %c0_2 = arith.constant 0 : index
    %c0_3 = arith.constant 0 : index
    %4 = vector.load %arg3[%c0_2, %c0_3] : memref<128x128xf32, #tpu.memory_space<vmem>>, vector<128x128xf32>
    %cst = arith.constant dense<0.000000e+00> : vector<64x128xf32>
    %5 = tpu.matmul %3, %4, %cst {dimension_numbers = #tpu.dot_dimension_numbers<[1], [0], [0], [1], [0, 0, 1, 1], [], []>} : vector<64x128xf32>, vector<128x128xf32>, vector<64x128xf32> -> vector<64x128xf32>
    %c0_4 = arith.constant 0 : index
    %c0_5 = arith.constant 0 : index
    %6 = vector.load %arg4[%c0_4, %c0_5] : memref<1x128xf32, #tpu.memory_space<vmem>>, vector<1x128xf32>
    %7 = vector.broadcast %6 : vector<1x128xf32> to vector<64x128xf32>
    %8 = arith.addf %5, %7 : vector<64x128xf32>
    %cst_6 = arith.constant 5.000000e-01 : f32
    %9 = vector.broadcast %cst_6 : f32 to vector<64x128xf32>
    %10 = arith.mulf %9, %8 : vector<64x128xf32>
    %cst_7 = arith.constant 0.707106769 : f32
    %11 = vector.broadcast %cst_7 : f32 to vector<64x128xf32>
    %12 = arith.mulf %8, %11 : vector<64x128xf32>
    %13 = math.erf %12 : vector<64x128xf32>
    %cst_8 = arith.constant 1.000000e+00 : f32
    %14 = vector.broadcast %cst_8 : f32 to vector<64x128xf32>
    %15 = arith.addf %14, %13 : vector<64x128xf32>
    %16 = arith.mulf %10, %15 : vector<64x128xf32>
    %c0_9 = arith.constant 0 : index
    %c0_10 = arith.constant 0 : index
    %17 = vector.load %arg8[%c0_9, %c0_10] : memref<64x128xf32, #tpu.memory_space<vmem>>, vector<64x128xf32>
    %c0_11 = arith.constant 0 : index
    %c0_12 = arith.constant 0 : index
    %18 = vector.load %arg5[%c0_11, %c0_12] : memref<128x128xf32, #tpu.memory_space<vmem>>, vector<128x128xf32>
    %cst_13 = arith.constant dense<0.000000e+00> : vector<64x128xf32>
    %19 = tpu.matmul %16, %18, %cst_13 {dimension_numbers = #tpu.dot_dimension_numbers<[1], [0], [0], [1], [0, 0, 1, 1], [], []>} : vector<64x128xf32>, vector<128x128xf32>, vector<64x128xf32> -> vector<64x128xf32>
    %20 = arith.addf %17, %19 : vector<64x128xf32>
    %c0_14 = arith.constant 0 : index
    %c0_15 = arith.constant 0 : index
    %21 = vector.load %arg8[%c0_14, %c0_15] : memref<64x128xf32, #tpu.memory_space<vmem>>, vector<64x128xf32>
    tpu.vector_store %arg8[%c0_14, %c0_15], %20 {strides = array<i32>} : memref<64x128xf32, #tpu.memory_space<vmem>>, vector<64x128xf32>,
    %c1_i32 = arith.constant 1 : i32
    %22 = arith.cmpi eq, %arg1, %c1_i32 : i32
    %23 = arith.extui %22 : i1 to i32
    %c0_i32_16 = arith.constant 0 : i32
    %24 = arith.cmpi ne, %23, %c0_i32_16 : i32
    scf.if %24 {
      %c0_17 = arith.constant 0 : index
      %c0_18 = arith.constant 0 : index
      %25 = vector.load %arg8[%c0_17, %c0_18] : memref<64x128xf32, #tpu.memory_space<vmem>>, vector<64x128xf32>
      %c0_19 = arith.constant 0 : index
      %c0_20 = arith.constant 0 : index
      %26 = vector.load %arg6[%c0_19, %c0_20] : memref<1x128xf32, #tpu.memory_space<vmem>>, vector<1x128xf32>
      %27 = vector.broadcast %26 : vector<1x128xf32> to vector<64x128xf32>
      %28 = arith.addf %25, %27 : vector<64x128xf32>
      %c0_21 = arith.constant 0 : index
      %c0_22 = arith.constant 0 : index
      %29 = vector.load %arg7[%c0_21, %c0_22] : memref<64x128xf32, #tpu.memory_space<vmem>>, vector<64x128xf32>
      tpu.vector_store %arg7[%c0_21, %c0_22], %28 {strides = array<i32>} : memref<64x128xf32, #tpu.memory_space<vmem>>, vector<64x128xf32>,
    } else {
    }
    return
  }
  func.func @transform_0(%arg0: i32, %arg1: i32) -> (i32, i32) {
    %c0_i32 = arith.constant 0 : i32
    %c0_i32_0 = arith.constant 0 : i32
    return %arg0, %c0_i32 : i32, i32
  }
  func.func @transform_1(%arg0: i32, %arg1: i32) -> (i32, i32) {
    %c0_i32 = arith.constant 0 : i32
    %c0_i32_0 = arith.constant 0 : i32
    return %c0_i32, %arg1 : i32, i32
  }
  func.func @transform_2(%arg0: i32, %arg1: i32) -> (i32, i32) {
    %c0_i32 = arith.constant 0 : i32
    %c0_i32_0 = arith.constant 0 : i32
    return %c0_i32, %arg1 : i32, i32
  }
  func.func @transform_3(%arg0: i32, %arg1: i32) -> (i32, i32) {
    %c0_i32 = arith.constant 0 : i32
    %c0_i32_0 = arith.constant 0 : i32
    return %arg1, %c0_i32 : i32, i32
  }
  func.func @transform_4(%arg0: i32, %arg1: i32) -> (i32, i32) {
    %c0_i32 = arith.constant 0 : i32
    %c0_i32_0 = arith.constant 0 : i32
    %c0_i32_1 = arith.constant 0 : i32
    return %c0_i32, %c0_i32_0 : i32, i32
  }
  func.func @transform_5(%arg0: i32, %arg1: i32) -> (i32, i32) {
    %c0_i32 = arith.constant 0 : i32
    %c0_i32_0 = arith.constant 0 : i32
    return %arg0, %c0_i32 : i32, i32
  }
}

</mosaic_0001>

<bundles_post_ra>
// kernel: feed_forward.1
= control target key start
LH: loop header
LB: loop body
LE: loop exit
PB: predicated region body
PF: predicated region fallthrough
CT: control target
= control target key end

     0   :  { %s1920_s0 = inlined_call_operand.hbm [shape: f32[128,128], index: 0, kind: input, shape index: {}]   ;;  %s1921_s1 = inlined_call_operand.hbm [shape: f32[128,256], index: 1, kind: input, shape index: {}]   ;;  %s1922_s2 = inlined_call_operand.vmem [shape: f32[1,256], index: 2, kind: input, shape index: {}]   ;;  %s1923_s3 = inlined_call_operand.hbm [shape: f32[256,128], index: 3, kind: input, shape index: {}]   ;;  %s1924_s4 = inlined_call_operand.vmem [shape: f32[1,128], index: 4, kind: input, shape index: {}]   ;;  %s1925_s5 = inlined_call_operand.hbm [shape: f32[128,128], index: 5, kind: output, shape index: {}]  }
   0x1   :  { %1942 = sst [smem:[#allocation21_spill]] %s1921_s1 }
   0x2   :  { %1943 = sst [smem:[#allocation22_spill]] %s1924_s4 }
   0x3   :  { %1944 = sst [smem:[#allocation23_spill]] %s1925_s5 }
   0x4   :  { %10 = vsyncpa [#allocation4], 0 }
   0x5   :  { %12 = vsyncpa [#allocation4 + $0x1], 0 }
   0x6   :  { %13 = vsyncpa [#allocation7], 0 }
   0x7   :  { %15 = vsyncpa [#allocation7 + $0x1], 0 }
   0x8   :  { %16 = vsyncpa [#allocation5], 0 }
   0x9   :  { %18 = vsyncpa [#allocation5 + $0x1], 0  ;;  %s1487_s18 = smov 0   ;;  %s1489_s19 = smov 0  }
   0xa   :  { %s1491_s20 = smov 0   ;;  %s1493_s21 = smov 0  }
   0xb   :  { %s1495_s22 = smov 0   ;;  %s1497_s23 = smov 0  }
   0xc   :  { %s1499_s24 = smov 0   ;;  %s1501_s25 = smov 0  }
   0xd   :  { %s1503_s26 = smov 0   ;;  %s1505_s27 = smov 0  }
   0xe   :  { %s1507_s28 = smov 0  }
   0xf LB: > { %1945 = sst [smem:[#allocation13_spill]] %s1413_s20  ;;  %s33_s29 = sadd.s32 1, %s1437_s26  ;;  %s1445_s28 = sphi %s1507_s28, %s24_s28   ;;  %s1441_s27 = sphi %s1505_s27, %s1985_s27   ;;  %s1437_s26 = sphi %s1503_s26, %s1991_s26   ;;  %s1433_s25 = sphi %s1501_s25, %s1983_s25   ;;  %s1429_s24 = sphi %s1499_s24, %s1990_s24   ;;  %s1425_s23 = sphi %s1497_s23, %s1982_s23   ;;  %s1421_s22 = sphi %s1495_s22, %s1989_s22   ;;  %s1417_s21 = sphi %s1493_s21, %s1988_s21   ;;  %s1413_s20 = sphi %s1491_s20, %s1980_s20   ;;  %s1409_s19 = sphi %s1489_s19, %s1987_s19   ;;  %s1405_s18 = sphi %s1487_s18, %s1986_s18  }
  0x10   : > { %1946 = sst [smem:[#allocation14_spill]] %s1425_s23  ;;  %p1928_p0 = scmp.eq.s32.totalorder %s1445_s28, 0 }
  0x11   : > { %1947 = sst [smem:[#allocation15_spill]] %s1433_s25  ;;  %p1544_p1 = scmp.ge.s32.totalorder %s33_s29, 2 }
  0x12   : > { %1948 = sst [smem:[#allocation16_spill]] %s1441_s27  ;;  %s69_s6 = sadd.s32 1, %s1413_s20 }
  0x13   : > { %p76_p2 = scmp.ne.s32.totalorder %s1413_s20, %s1409_s19  ;;  %s1993_s29 = smov (%p1544_p1, %s33_s29), 0 }
  0x14   : > { %1950 = sst [smem:[#allocation17_spill]] %s1993_s29  ;;  %s66_s7 = ssub.s32 %s1437_s26, %s1993_s29 }
  0x15   : > { %p78_p4 = por %p76_p2, %p1928_p0  ;;  %p1927_p5 = scmp.lt.s32.totalorder %s1445_s28, 4 }
  0x16   : > { %p67_p6 = scmp.eq.s32.totalorder %s66_s7, 0  ;;  %s229_s8 = sand.u32 1, %s1445_s28  }
  0x17   : > { %s231_s10 = sand.u32 1, %s1413_s20   ;;  %s874_s12 = sshll.u32 %s1437_s26, 7 }
  0x18   : > { %s1564_s9 = scalar_select %p67_p6, %s1413_s20, %s69_s6  }
  0x19   : > { %s1567_s11 = sshll.u32 %s231_s10, 7  ;;  %s1952_s1 = sld [smem:[#allocation21_spill]] }
  0x1a   : > { %1951 = sst [smem:[#allocation18_spill]] %s1564_s9  ;;  %s233_s16 = scalar_lea.vmem [#allocation6], %s1567_s11 }
  0x1b   : > { %s239_s17 = sshll.u32 %s233_s16, 4  ;;  %p1578_p7 = pnand %p1927_p5, %p78_p4  ;;  %s1582_s17 = int_to_ptr.vmem [resolvable:$true] %s239_s17 }
  0x1c   : > { %s1585_s7 = scalar_lea.sflag [#allocation7], %s229_s8 }
  0x1d   : > { %p1931_p10 = pneg %p1578_p7 }
  0x1f   : > { %s1573_s15 = scalar_lea.hbm %s1952_s1, %s874_s12  ;;  %s1234_s14 = scalar_lea.hbm %s1952_s1, 4096 }
  0x20   : > { %s1229_s10 = scalar_lea.hbm %s1573_s15, 2048  ;;  %p1235_p13 = scmp.lt.u32.totalorder %s1573_s15, %s1952_s1 }
  0x21   : > { %p1230_p9 = scmp.ne.s32.totalorder %s1573_s15, %s1229_s10  ;;  %p1236_p2 = scmp.lt.u32.totalorder %s1234_s14, %s1229_s10 }
  0x22   : > { %p1238_p6 = scmp.lt.u32.totalorder %s1229_s10, %s1573_s15 }
  0x23   : > { %p1232_p11 = pnand %p1931_p10, %p1230_p9  ;;  %p1237_p4 = por %p1236_p2, %p1235_p13 }
  0x25   : > { %p1233_p12 = pneg %p1232_p11  ;;  %p1239_p5 = por %p1238_p6, %p1237_p4 }
  0x27   : > { %p1240_p3 = pnand %p1239_p5, %p1233_p12 }
  0x29   : > { %1243 = shalt.err (!%p1240_p3)
}
  0x2a   : > { %s1244_s8 = scalar_lea.vmem %s1582_s17, 2048  ;;  %s1447_s12 = smov [#allocation6]  }
  0x2b   : > { %p1245_p9 = scmp.ne.s32.totalorder %s1582_s17, %s1244_s8  ;;  %s1249_s13 = sshll.u32 %s1447_s12, 4  ;;  %s1250_s13 = int_to_ptr.vmem [resolvable:$false] %s1249_s13 }
  0x2c   : > { %s1251_s29 = scalar_lea.vmem %s1250_s13, 4096  ;;  %p1252_p8 = scmp.lt.s32.totalorder %s1582_s17, %s1250_s13 }
  0x2d   : > { %p1247_p11 = pnand %p1245_p9, %p1931_p10  ;;  %p1253_p13 = scmp.lt.s32.totalorder %s1251_s29, %s1244_s8 }
  0x2f   : > { %p1248_p0 = pneg %p1247_p11  ;;  %p1254_p2 = por %p1253_p13, %p1252_p8 }
  0x31   : > { %p1255_p4 = pnand %p1254_p2, %p1248_p0 }
  0x33   : > { %1258 = shalt.err (!%p1255_p4)
}
  0x34   : > { %s1448_s10 = smov 256   ;;  %s1929_s14 = smov 128  }
  0x35   : > { %s1932_s16 = smov 8   ;;  %p274_p0 = scmp.lt.s32.totalorder %s1445_s28, 5 }
  0x36   : > { %1109 = dma.hbm_to_vmem [thread:$0]  (!%p1578_p7), %s1573_s15, 2048, %s1582_s17, %s1585_s7, %s1448_s10, %s1929_s14, %s1932_s16  }
  0x37   : > { %p1954_p3 = scmp.ge.s32.totalorder %s1445_s28, 1  ;;  %s1623_s12 = sadd.s32 4294967295, %s1445_s28  }
  0x38   : > { %s867_s13 = sadd.s32 4294967294, %s1445_s28   ;;  %s36_s29 = sadd.s32 1, %s1441_s27 }
  0x39   : > { %p1618_p5 = pnand %p1954_p3, %p274_p0  ;;  %s43_s1 = sadd.s32 1, %s1425_s23 }
  0x3a   : > { %s1995_s29 = smov (!%p1544_p1, %s36_s29), %s1441_s27  ;;  %p50_p8 = scmp.ne.s32.totalorder %s1425_s23, %s1421_s22 }
  0x3b   : > { %s1955_s8 = scalar_select %p1618_p5, 1, 0 }
  0x3c   : > { %p56_p12 = scmp.ne.s32.totalorder %s1421_s22, %s1417_s21  ;;  %p38_p6 = scmp.ge.s32.totalorder %s1995_s29, 2 }
  0x3d   : > { %p57_p9 = scmp.eq.s32.totalorder %s1623_s12, 0  ;;  %p1956_p11 = scmp.eq.s32.totalorder %s1445_s28, 0 }
  0x3e   : > { %p179_p2 = scmp.eq.s32.totalorder %s1623_s12, 3  ;;  %s1997_s29 = smov (%p38_p6, %s1995_s29), 0 }
  0x3f   : > { %p1638_p13 = por %p1956_p11, %p50_p8  ;;  %1958 = sst [smem:[#allocation19_spill]] %s1997_s29 }
  0x40   : > { %p1648_p1 = por %p57_p9, %p56_p12  ;;  %p1960_p4 = scmp.ne.s32.totalorder %s1409_s19, %s1405_s18 }
  0x41   : > { %s40_s10 = ssub.s32 %s1441_s27, %s1997_s29  ;;  %p1661_p3 = por %p179_p2, %p50_p8 }
  0x42   : > { %s1959_s30 = scalar_select %p1648_p1, 1, 0 }
  0x43   : > { %p1655_p0 = por %p1960_p4, %p57_p9  ;;  %p41_p11 = scmp.eq.s32.totalorder %s40_s10, 0 }
  0x44   : > { %s1962_s14 = scalar_select %p1661_p3, 1, 0 }
  0x45   : > { %s1961_s17 = scalar_select %p1655_p0, 1, 0 }
  0x46   : > { %p185_p10 = scmp.eq.s32.totalorder %s867_s13, 3  ;;  %s208_s16 = sand.u32 1, %s1425_s23  }
  0x47   : > { %s892_s9 = sshll.u32 %s1441_s27, 10  ;;  %s870_s18 = sshll.u32 %s208_s16, 6 }
  0x48   : > { %s1668_s20 = scalar_select %p41_p11, %s1425_s23, %s43_s1  }
  0x49   : > { %p1673_p6 = por %p185_p10, %p56_p12  ;;  %s1680_s29 = scalar_lea.hbm %s1920_s0, %s892_s9 }
  0x4a   : > { %1963 = sst [smem:[#allocation20_spill]] %s1668_s20  ;;  %p1965_p8 = scmp.lt.s32.totalorder %s1445_s28, 4 }
  0x4b   : > { %s1964_s5 = scalar_select %p1673_p6, 1, 0 }
  0x4c   : > { %p1686_p9 = pnand %p1965_p8, %p1638_p13  ;;  %s212_s13 = scalar_lea.vmem [#allocation3], %s870_s18 }
  0x4d   : > { %s219_s10 = sshll.u32 %s212_s13, 4  ;;  %s1692_s27 = scalar_lea.sflag [#allocation4], %s208_s16  ;;  %s1690_s10 = int_to_ptr.vmem [resolvable:$true] %s219_s10 }
  0x4e   : > { %s1259_s4 = scalar_lea.hbm %s1680_s29, 1024  ;;  %p1261_p12 = pneg %p1686_p9 }
  0x4f   : > { %p1260_p10 = scmp.ne.s32.totalorder %s1680_s29, %s1259_s4  ;;  %s1264_s15 = scalar_lea.hbm %s1920_s0, 2048 }
  0x50   : > { %p1265_p13 = scmp.lt.u32.totalorder %s1680_s29, %s1920_s0  ;;  %p1266_p11 = scmp.lt.u32.totalorder %s1264_s15, %s1259_s4 }
  0x51   : > { %p1262_p2 = pnand %p1261_p12, %p1260_p10  ;;  %p1268_p6 = scmp.lt.u32.totalorder %s1259_s4, %s1680_s29 }
  0x52   : > { %p1267_p8 = por %p1266_p11, %p1265_p13 }
  0x53   : > { %p1263_p4 = pneg %p1262_p2 }
  0x54   : > { %p1269_p3 = por %p1268_p6, %p1267_p8 }
  0x56   : > { %p1270_p0 = pnand %p1269_p3, %p1263_p4 }
  0x58   : > { %1273 = shalt.err (!%p1270_p0)
}
  0x59   : > { %s1274_s16 = scalar_lea.vmem %s1690_s10, 1024  ;;  %s1451_s18 = smov [#allocation3]  }
  0x5a   : > { %p1275_p10 = scmp.ne.s32.totalorder %s1690_s10, %s1274_s16  ;;  %s1279_s13 = sshll.u32 %s1451_s18, 4  ;;  %s1280_s13 = int_to_ptr.vmem [resolvable:$false] %s1279_s13 }
  0x5b   : > { %s1281_s20 = scalar_lea.vmem %s1280_s13, 2048  ;;  %p1282_p5 = scmp.lt.s32.totalorder %s1690_s10, %s1280_s13 }
  0x5c   : > { %p1277_p2 = pnand %p1275_p10, %p1261_p12  ;;  %p1283_p13 = scmp.lt.s32.totalorder %s1281_s20, %s1274_s16 }
  0x5e   : > { %p1278_p1 = pneg %p1277_p2  ;;  %p1284_p11 = por %p1283_p13, %p1282_p5 }
  0x60   : > { %p1285_p6 = pnand %p1284_p11, %p1278_p1 }
  0x62   : > { %1288 = shalt.err (!%p1285_p6)
}
  0x63   : > { %s1967_s23 = smov 8   ;;  %s1968_s4 = smov 128  }
  0x64   : > { %1106 = dma.hbm_to_vmem [thread:$0]  (!%p1686_p9), %s1680_s29, 1024, %s1690_s10, %s1692_s27, %s1968_s4, %s1968_s4, %s1967_s23  }
  0x65   : > { %s893_s25 = sshll.u32 %s1437_s26, 11  ;;  %s259_s9 = scalar_lea.vmem [#allocation8], %s1567_s11 }
  0x66   : > { %s266_s15 = sshll.u32 %s259_s9, 4  ;;  %s1728_s13 = scalar_lea.hbm %s1923_s3, %s893_s25  ;;  %s1730_s15 = int_to_ptr.vmem [resolvable:$true] %s266_s15 }
  0x67   : > { %s1289_s1 = scalar_lea.hbm %s1728_s13, 2048  ;;  %p1969_p1 = pneg %p1578_p7 }
  0x68   : > { %p1290_p5 = scmp.ne.s32.totalorder %s1728_s13, %s1289_s1  ;;  %s1294_s29 = scalar_lea.hbm %s1923_s3, 4096 }
  0x69   : > { %p1295_p9 = scmp.lt.u32.totalorder %s1728_s13, %s1923_s3  ;;  %p1296_p12 = scmp.lt.u32.totalorder %s1294_s29, %s1289_s1 }
  0x6a   : > { %p1292_p0 = pnand %p1290_p5, %p1969_p1  ;;  %p1298_p8 = scmp.lt.u32.totalorder %s1289_s1, %s1728_s13 }
  0x6b   : > { %p1297_p4 = por %p1296_p12, %p1295_p9 }
  0x6c   : > { %p1293_p3 = pneg %p1292_p0 }
  0x6d   : > { %p1299_p10 = por %p1298_p8, %p1297_p4 }
  0x6f   : > { %p1300_p2 = pnand %p1299_p10, %p1293_p3 }
  0x71   : > { %1303 = shalt.err (!%p1300_p2)
}
  0x72   : > { %s1304_s25 = scalar_lea.vmem %s1730_s15, 2048  ;;  %p1970_p11 = pmov %p1969_p1 }
  0x73   : > { %p1305_p13 = scmp.ne.s32.totalorder %s1730_s15, %s1304_s25  ;;  %s1452_s9 = smov [#allocation8]  }
  0x74   : > { %s1309_s18 = sshll.u32 %s1452_s9, 4  ;;  %s1310_s18 = int_to_ptr.vmem [resolvable:$false] %s1309_s18 }
  0x75   : > { %p1307_p6 = pnand %p1305_p13, %p1970_p11  ;;  %s1311_s16 = scalar_lea.vmem %s1310_s18, 4096 }
  0x76   : > { %p1312_p1 = scmp.lt.s32.totalorder %s1730_s15, %s1310_s18  ;;  %p1313_p0 = scmp.lt.s32.totalorder %s1311_s16, %s1304_s25 }
  0x77   : > { %p1308_p5 = pneg %p1307_p6 }
  0x78   : > { %p1314_p9 = por %p1313_p0, %p1312_p1 }
  0x7a   : > { %p1315_p12 = pnand %p1314_p9, %p1308_p5 }
  0x7c   : > { %1318 = shalt.err (!%p1315_p12)
}
  0x7d   : > { %1112 = dma.hbm_to_vmem [thread:$0]  (!%p1578_p7), %s1728_s13, 2048, %s1730_s15, %s1585_s7, %s1968_s4, %s1968_s4, %s1967_s23  }
  0x7e   : > { %p1971_p3 = scmp.ne.s32.totalorder %s1955_s8, 0 }
  0x7f   : > { %s1762_s1 = sand.u32 (!%p1971_p3), 1, %s1421_s22   ;;  %p1972_p4 = scmp.ne.s32.totalorder (!%p1971_p3), %s1959_s30, 0 }
  0x80   : > { %278 = sbr.rel (%p1971_p3) target bundleno = 685 (0x2ad), region = 40  ;;  %s879_s27 = sshll.u32 (!%p1971_p3), %s1762_s1, 6 }
  0x81   : > { %s281_s11 = scalar_lea.sflag (!%p1971_p3), [#allocation4], %s1762_s1  ;;  %s1766_s29 = scalar_lea.vmem (!%p1971_p3), [#allocation3], %s879_s27 }
  0x87   : > { %1392 = dma.done.wait (%p1972_p4), %s281_s11, 1024  }
  0x88   : > { %1394 = vsyncadd (%p1972_p4), %s281_s11, 4294966272  ;;  %s289_s6 = sand.u32 1, %s1623_s12   ;;  %s291_s7 = sand.u32 1, %s1409_s19  }
  0x89   : > { %s880_s8 = sshll.u32 %s291_s7, 7  ;;  %s290_s23 = scalar_lea.sflag [#allocation7], %s289_s6 }
  0x8a   : > { %s1774_s4 = scalar_lea.vmem [#allocation6], %s880_s8  ;;  %p1973_p7 = scmp.ne.s32.totalorder %s1961_s17, 0 }
  0x8c   : > { %1396 = dma.done.wait (%p1973_p7), %s290_s23, 4096  }
  0x8d   : > { %1398 = vsyncadd (%p1973_p7), %s290_s23, 4294963200  ;;  %p343_p8 = scmp.lt.s32.totalorder %s1429_s24, 1  ;;  %s1788_s10 = scalar_lea.vmem [#allocation8], %s880_s8 }
  0x8e   : > { %s1790_s20 = scalar_lea.vmem [#allocation9], %s879_s27  ;;  %p883_p10 = scmp.ne.s32.totalorder %s1429_s24, 0 }
  0x8f   : > { %s1782_s15 = scalar_select %p343_p8, %s1429_s24, 1 }
  0x90   : > { %351 = sbr.rel (%p883_p10) target bundleno = 151 (0x97), region = 56  ;;  %v1453_v0 = vmov (!%p883_p10), 0.0  }
  0x91   : > { %s345_s12 = scalar_lea.vmem %s1922_s2, %s1782_s15  ;;  %352 = vst [vmem:[#allocation2] sm:$0xff] (!%p883_p10), %v1453_v0  ;;  %353 = vst [vmem:[#allocation2 + $0x8] sm:$0xff] (!%p883_p10), %v1453_v0 }
  0x92   : > { %354 = vst [vmem:[#allocation2 + $0x10] sm:$0xff] (!%p883_p10), %v1453_v0  ;;  %355 = vst [vmem:[#allocation2 + $0x18] sm:$0xff] (!%p883_p10), %v1453_v0 }
  0x93   : > { %356 = vst [vmem:[#allocation2 + $0x20] sm:$0xff] (!%p883_p10), %v1453_v0  ;;  %357 = vst [vmem:[#allocation2 + $0x28] sm:$0xff] (!%p883_p10), %v1453_v0 }
  0x94   : > { %358 = vst [vmem:[#allocation2 + $0x30] sm:$0xff] (!%p883_p10), %v1453_v0  ;;  %359 = vst [vmem:[#allocation2 + $0x38] sm:$0xff] (!%p883_p10), %v1453_v0 }
  0x97 PF: > { %v368_v1 = vld [vmem:[%s1774_s4] sm:$0xff]  ;;  %v369_v2 = vld [vmem:[%s1774_s4 + $0x8] sm:$0xff]  ;;  %v370_v3 = vld [vmem:[%s1774_s4 + $0x10] sm:$0xff]  ;;  %p885_p2 = scmp.ne.s32.totalorder %s1429_s24, 1 }
  0x98   : > { %v1031_v4 = vpack.c.bf16 %v369_v2, %v368_v1  ;;  %v371_v5 = vld [vmem:[%s1774_s4 + $0x18] sm:$0xff]  ;;  %v372_v7 = vld [vmem:[%s1774_s4 + $0x20] sm:$0xff]  ;;  %v373_v8 = vld [vmem:[%s1774_s4 + $0x28] sm:$0xff]  ;;  %s1974_s16 = sld [smem:[#allocation22_spill]] (!%p885_p2) }
  0x99   : > { %v1035_v6 = vpack.c.bf16 %v371_v5, %v370_v3  ;;  %v1039_v9 = vpack.c.bf16 %v373_v8, %v372_v7  ;;  %v360_v10 = vld [vmem:[%s1766_s29] sm:$0xff]  ;;  %v374_v11 = vld [vmem:[%s1774_s4 + $0x30] sm:$0xff]  ;;  %v375_v12 = vld [vmem:[%s1774_s4 + $0x38] sm:$0xff] }
  0x9a   : > { %1032 = vmatprep.subr.bf16.mxu0 %v1031_v4  ;;  %975 = vmatprep.mubr.f32.mxu0 %v360_v10  ;;  %v544_v13 = vld [vmem:[%s1788_s10] sm:$0xff]  ;;  %v545_v14 = vld [vmem:[%s1788_s10 + $0x8] sm:$0xff]  ;;  %v546_v15 = vld [vmem:[%s1788_s10 + $0x10] sm:$0xff]  ;;  %v1043_v16 = vpack.c.bf16 %v375_v12, %v374_v11 }
  0x9b   : > { %1034 = vmatpush3.bf16.msra.mxu0 %v1031_v4  ;;  %v376_v17 = vld [vmem:[%s1774_s4 + $0x40] sm:$0xff]  ;;  %v1063_v18 = vpack.c.bf16 %v545_v14, %v544_v13  ;;  %v547_v19 = vld [vmem:[%s1788_s10 + $0x18] sm:$0xff]  ;;  %v377_v20 = vld [vmem:[%s1774_s4 + $0x48] sm:$0xff] }
  0x9c   : > { %1036 = vmatprep.subr.bf16.mxu0 %v1035_v6  ;;  %v1067_v21 = vpack.c.bf16 %v547_v19, %v546_v15  ;;  %v548_v22 = vld [vmem:[%s1788_s10 + $0x20] sm:$0xff]  ;;  %v549_v23 = vld [vmem:[%s1788_s10 + $0x28] sm:$0xff]  ;;  %v1047_v24 = vpack.c.bf16 %v377_v20, %v376_v17  ;;  %v378_v26 = vld [vmem:[%s1774_s4 + $0x50] sm:$0xff] }
  0x9d   : > { %1064 = vmatprep.subr.bf16.mxu1 %v1063_v18  ;;  %v1071_v25 = vpack.c.bf16 %v549_v23, %v548_v22  ;;  %v379_v27 = vld [vmem:[%s1774_s4 + $0x58] sm:$0xff]  ;;  %v380_v29 = vld [vmem:[%s1774_s4 + $0x60] sm:$0xff]  ;;  %v381_v30 = vld [vmem:[%s1774_s4 + $0x68] sm:$0xff] }
  0x9e   : > { %1066 = vmatpush3.bf16.msra.mxu1 %v1063_v18  ;;  %v1051_v28 = vpack.c.bf16 %v379_v27, %v378_v26  ;;  %v1055_v31 = vpack.c.bf16 %v381_v30, %v380_v29  ;;  %v382_v32 = vld [vmem:[%s1774_s4 + $0x70] sm:$0xff]  ;;  %v383_v33 = vld [vmem:[%s1774_s4 + $0x78] sm:$0xff]  ;;  %v361_v35 = vld [vmem:[%s1766_s29 + $0x8] sm:$0xff] }
  0x9f   : > { %1038 = vmatpush3.bf16.msra.mxu0 %v1035_v6  ;;  %1068 = vmatprep.subr.bf16.mxu1 %v1067_v21  ;;  %v1059_v34 = vpack.c.bf16 %v383_v33, %v382_v32  ;;  %v362_v36 = vld [vmem:[%s1766_s29 + $0x10] sm:$0xff]  ;;  %v363_v37 = vld [vmem:[%s1766_s29 + $0x18] sm:$0xff]  ;;  %v364_v38 = vld [vmem:[%s1766_s29 + $0x20] sm:$0xff] }
  0xa0   : > { %1040 = vmatprep.subr.bf16.mxu0 %v1039_v9  ;;  %v365_v39 = vld [vmem:[%s1766_s29 + $0x28] sm:$0xff]  ;;  %v366_v40 = vld [vmem:[%s1766_s29 + $0x30] sm:$0xff]  ;;  %v367_v41 = vld [vmem:[%s1766_s29 + $0x38] sm:$0xff] }
  0xa1   : > { %v550_v42 = vld [vmem:[%s1788_s10 + $0x30] sm:$0xff]  ;;  %v551_v43 = vld [vmem:[%s1788_s10 + $0x38] sm:$0xff]  ;;  %v552_v45 = vld [vmem:[%s1788_s10 + $0x40] sm:$0xff] }
  0xa2   : > { %1070 = vmatpush3.bf16.msra.mxu1 %v1067_v21  ;;  %v1075_v44 = vpack.c.bf16 %v551_v43, %v550_v42  ;;  %v553_v46 = vld [vmem:[%s1788_s10 + $0x48] sm:$0xff]  ;;  %v554_v48 = vld [vmem:[%s1788_s10 + $0x50] sm:$0xff]  ;;  %v555_v49 = vld [vmem:[%s1788_s10 + $0x58] sm:$0xff] }
  0xa3   : > { %1042 = vmatpush3.bf16.msra.mxu0 %v1039_v9  ;;  %1072 = vmatprep.subr.bf16.mxu1 %v1071_v25  ;;  %v1079_v47 = vpack.c.bf16 %v553_v46, %v552_v45  ;;  %v1083_v50 = vpack.c.bf16 %v555_v49, %v554_v48  ;;  %v556_v51 = vld [vmem:[%s1788_s10 + $0x60] sm:$0xff]  ;;  %v557_v52 = vld [vmem:[%s1788_s10 + $0x68] sm:$0xff]  ;;  %v558_v54 = vld [vmem:[%s1788_s10 + $0x70] sm:$0xff] }
  0xa4   : > { %1044 = vmatprep.subr.bf16.mxu0 %v1043_v16  ;;  %v1087_v53 = vpack.c.bf16 %v557_v52, %v556_v51  ;;  %v559_v55 = vld [vmem:[%s1788_s10 + $0x78] sm:$0xff]  ;;  %v884_v57 = vld [vmem:[%s345_s12] ss:$0 sm:$0xff] }
  0xa5   : > { %v1091_v56 = vpack.c.bf16 %v559_v55, %v558_v54  ;;  %v536_v51 = vld [vmem:[#allocation2] sm:$0xff] }
  0xa6   : > { %1074 = vmatpush3.bf16.msra.mxu1 %v1071_v25 }
  0xa7   : > { %1046 = vmatpush3.bf16.msra.mxu0 %v1043_v16  ;;  %1076 = vmatprep.subr.bf16.mxu1 %v1075_v44 }
  0xa8   : > { %1048 = vmatprep.subr.bf16.mxu0 %v1047_v24 }
  0xaa   : > { %1078 = vmatpush3.bf16.msra.mxu1 %v1075_v44 }
  0xab   : > { %1050 = vmatpush3.bf16.msra.mxu0 %v1047_v24  ;;  %1080 = vmatprep.subr.bf16.mxu1 %v1079_v47 }
  0xac   : > { %1052 = vmatprep.subr.bf16.mxu0 %v1051_v28 }
  0xae   : > { %1082 = vmatpush3.bf16.msra.mxu1 %v1079_v47 }
  0xaf   : > { %1054 = vmatpush3.bf16.msra.mxu0 %v1051_v28  ;;  %1084 = vmatprep.subr.bf16.mxu1 %v1083_v50 }
  0xb0   : > { %1056 = vmatprep.subr.bf16.mxu0 %v1055_v31 }
  0xb2   : > { %1086 = vmatpush3.bf16.msra.mxu1 %v1083_v50  ;;  %v537_v50 = vld [vmem:[#allocation2 + $0x8] sm:$0xff] }
  0xb3   : > { %1058 = vmatpush3.bf16.msra.mxu0 %v1055_v31  ;;  %1088 = vmatprep.subr.bf16.mxu1 %v1087_v53 }
  0xb4   : > { %1060 = vmatprep.subr.bf16.mxu0 %v1059_v34 }
  0xb6   : > { %1090 = vmatpush3.bf16.msra.mxu1 %v1087_v53 }
  0xb7   : > { %1062 = vmatpush3.bf16.msra.mxu0 %v1059_v34  ;;  %1092 = vmatprep.subr.bf16.mxu1 %v1091_v56 }
  0xba   : > { %976 = vmatmul.mubr.f32.vlgmr.msra.gmra.mrb[0].mxu0 %v361_v35  ;;  %1094 = vmatpush3.bf16.msra.mxu1 %v1091_v56  ;;  %v539_v56 = vld [vmem:[#allocation2 + $0x18] sm:$0xff] }
  0xbb   : > { %978 = vmatprep.mubr.f32.mxu0 %v362_v36 }
  0xbe   : > { %979 = vmatmul.mubr.f32.gmra.mrb[2].mxu0 %v363_v37 }
  0xbf   : > { %981 = vmatprep.mubr.f32.mxu0 %v364_v38 }
  0xc2   : > { %982 = vmatmul.mubr.f32.gmra.mrb[4].mxu0 %v365_v39 }
  0xc3   : > { %984 = vmatprep.mubr.f32.mxu0 %v366_v40 }
  0xc6   : > { %985 = vmatmul.mubr.f32.gmra.mrb[6].mxu0 %v367_v41 }
 0x18d   : > { %v977_v58 = vpop.f32.mrb[0].mxu0 }
 0x18e   : > { %v463_v59 = vadd.f32 %v977_v58, %v884_v57  ;;  %v457_v60 = vpop.f32.mrb[1].mxu0 }
 0x18f   : > { %v458_v61 = vadd.f32 %v884_v57, %v457_v60 }
 0x190   : > { %v505_v62 = vmul.f32 0.70710677, %v463_v59  ;;  %v497_v23 = vmul.f32 0.5, %v463_v59 }
 0x191   : > { %v504_v63 = vmul.f32 0.70710677, %v458_v61  ;;  %v980_v0 = vpop.f32.mrb[2].mxu0  ;;  %v496_v21 = vmul.f32 0.5, %v458_v61 }
 0x192   : > { %1213 = verf.f32 %v505_v62  ;;  %v473_v1 = vadd.f32 %v980_v0, %v884_v57  ;;  %v467_v2 = vpop.f32.mrb[3].mxu0  ;;  %v541_v62 = vld [vmem:[#allocation2 + $0x28] sm:$0xff] }
 0x193   : > { %1215 = verf.f32 %v504_v63  ;;  %v468_v3 = vadd.f32 %v884_v57, %v467_v2  ;;  %v540_v63 = vld [vmem:[#allocation2 + $0x20] sm:$0xff] }
 0x194   : > { %v507_v4 = vmul.f32 0.70710677, %v473_v1  ;;  %v499_v31 = vmul.f32 0.5, %v473_v1 }
 0x195   : > { %v506_v5 = vmul.f32 0.70710677, %v468_v3  ;;  %v983_v6 = vpop.f32.mrb[4].mxu0  ;;  %v498_v29 = vmul.f32 0.5, %v468_v3 }
 0x196   : > { %1217 = verf.f32 %v507_v4  ;;  %v483_v7 = vadd.f32 %v983_v6, %v884_v57  ;;  %v477_v8 = vpop.f32.mrb[5].mxu0  ;;  %v543_v4 = vld [vmem:[#allocation2 + $0x38] sm:$0xff] }
 0x197   : > { %1219 = verf.f32 %v506_v5  ;;  %v478_v9 = vadd.f32 %v884_v57, %v477_v8  ;;  %v542_v5 = vld [vmem:[#allocation2 + $0x30] sm:$0xff] }
 0x198   : > { %v509_v10 = vmul.f32 0.70710677, %v483_v7  ;;  %v501_v39 = vmul.f32 0.5, %v483_v7 }
 0x199   : > { %v508_v11 = vmul.f32 0.70710677, %v478_v9  ;;  %v986_v12 = vpop.f32.mrb[6].mxu0  ;;  %v500_v37 = vmul.f32 0.5, %v478_v9 }
 0x19a   : > { %1221 = verf.f32 %v509_v10  ;;  %v493_v13 = vadd.f32 %v986_v12, %v884_v57  ;;  %v487_v14 = vpop.f32.mrb[7].mxu0 }
 0x19b   : > { %1223 = verf.f32 %v508_v11  ;;  %v488_v15 = vadd.f32 %v884_v57, %v487_v14  ;;  %v538_v57 = vld [vmem:[#allocation2 + $0x10] sm:$0xff]  ;;  %v886_v11 = vld [vmem:[%s1974_s16] ss:$0 sm:$0xff] (!%p885_p2) }
 0x19c   : > { %v1214_v16 = vpop.eup %1213  ;;  %v511_v17 = vmul.f32 0.70710677, %v493_v13  ;;  %v503_v47 = vmul.f32 0.5, %v493_v13 }
 0x19d   : > { %v1216_v18 = vpop.eup %1215  ;;  %v521_v19 = vadd.f32 1.0, %v1214_v16  ;;  %v510_v20 = vmul.f32 0.70710677, %v488_v15  ;;  %v502_v45 = vmul.f32 0.5, %v488_v15 }
 0x19e   : > { %1225 = verf.f32 %v511_v17  ;;  %v520_v22 = vadd.f32 1.0, %v1216_v18 }
 0x19f   : > { %1227 = verf.f32 %v510_v20  ;;  %v529_v28 = vmul.f32 %v521_v19, %v497_v23 }
 0x1a0   : > { %v1218_v24 = vpop.eup %1217  ;;  %v528_v25 = vmul.f32 %v520_v22, %v496_v21 }
 0x1a1   : > { %v1220_v26 = vpop.eup %1219  ;;  %v523_v27 = vadd.f32 1.0, %v1218_v24 }
 0x1a2   : > { %v522_v30 = vadd.f32 1.0, %v1220_v26  ;;  %1019 = vmatprep.mubr.f32.mxu1 %v528_v25 }
 0x1a3   : > { %1020 = vmatmul.mubr.f32.vlgmr.msra.gmra.mrb[0].mxu1 %v529_v28  ;;  %v531_v36 = vmul.f32 %v523_v27, %v499_v31 }
 0x1a4   : > { %v1222_v32 = vpop.eup %1221  ;;  %v530_v33 = vmul.f32 %v522_v30, %v498_v29 }
 0x1a5   : > { %v1224_v34 = vpop.eup %1223  ;;  %v525_v35 = vadd.f32 1.0, %v1222_v32 }
 0x1a6   : > { %v524_v38 = vadd.f32 1.0, %v1224_v34  ;;  %1022 = vmatprep.mubr.f32.mxu1 %v530_v33 }
 0x1a7   : > { %1023 = vmatmul.mubr.f32.gmra.mrb[2].mxu1 %v531_v36  ;;  %v533_v44 = vmul.f32 %v525_v35, %v501_v39 }
 0x1a8   : > { %v1226_v40 = vpop.eup %1225  ;;  %v532_v41 = vmul.f32 %v524_v38, %v500_v37 }
 0x1a9   : > { %v1228_v42 = vpop.eup %1227  ;;  %v527_v43 = vadd.f32 1.0, %v1226_v40 }
 0x1aa   : > { %v526_v46 = vadd.f32 1.0, %v1228_v42  ;;  %1025 = vmatprep.mubr.f32.mxu1 %v532_v41 }
 0x1ab   : > { %1026 = vmatmul.mubr.f32.gmra.mrb[4].mxu1 %v533_v44  ;;  %v535_v49 = vmul.f32 %v527_v43, %v503_v47 }
 0x1ac   : > { %v534_v48 = vmul.f32 %v526_v46, %v502_v45 }
 0x1ae   : > { %1028 = vmatprep.mubr.f32.mxu1 %v534_v48 }
 0x1af   : > { %1029 = vmatmul.mubr.f32.gmra.mrb[6].mxu1 %v535_v49 }
 0x276   : > { %v1021_v52 = vpop.f32.mrb[0].mxu1 }
 0x277   : > { %v666_v53 = vadd.f32 %v1021_v52, %v537_v50  ;;  %v626_v54 = vpop.f32.mrb[1].mxu1 }
 0x278   : > { %v665_v55 = vadd.f32 %v626_v54, %v536_v51 }
 0x279   : > { %674 = vst [vmem:[#allocation2 + $0x8] sm:$0xff] %v666_v53 }
 0x27a   : > { %673 = vst [vmem:[#allocation2] sm:$0xff] %v665_v55  ;;  %v1024_v58 = vpop.f32.mrb[2].mxu1 }
 0x27b   : > { %v668_v59 = vadd.f32 %v1024_v58, %v539_v56  ;;  %v636_v60 = vpop.f32.mrb[3].mxu1 }
 0x27c   : > { %v667_v61 = vadd.f32 %v636_v60, %v538_v57 }
 0x27d   : > { %676 = vst [vmem:[#allocation2 + $0x18] sm:$0xff] %v668_v59 }
 0x27e   : > { %675 = vst [vmem:[#allocation2 + $0x10] sm:$0xff] %v667_v61  ;;  %v1027_v0 = vpop.f32.mrb[4].mxu1 }
 0x27f   : > { %v670_v1 = vadd.f32 %v1027_v0, %v541_v62  ;;  %v646_v2 = vpop.f32.mrb[5].mxu1 }
 0x280   : > { %v669_v3 = vadd.f32 %v646_v2, %v540_v63  ;;  %684 = sbr.rel (%p885_p2) target bundleno = 657 (0x291), region = 60  ;;  %v686_v12 = vld [vmem:[#allocation2 + $0x8] sm:$0xff] (!%p885_p2) }
 0x281   : > { %678 = vst [vmem:[#allocation2 + $0x28] sm:$0xff] %v670_v1  ;;  %v685_v10 = vld [vmem:[#allocation2] sm:$0xff] (!%p885_p2)  ;;  %v701_v14 = vadd.f32 (!%p885_p2), %v886_v11, %v686_v12 }
 0x282   : > { %677 = vst [vmem:[#allocation2 + $0x20] sm:$0xff] %v669_v3  ;;  %v1030_v6 = vpop.f32.mrb[6].mxu1  ;;  %v700_v13 = vadd.f32 (!%p885_p2), %v886_v11, %v685_v10 }
 0x283   : > { %v672_v7 = vadd.f32 %v1030_v6, %v543_v4  ;;  %v656_v8 = vpop.f32.mrb[7].mxu1  ;;  %709 = vst [vmem:[%s1790_s20 + $0x8] sm:$0xff] (!%p885_p2), %v701_v14 }
 0x284   : > { %v671_v9 = vadd.f32 %v656_v8, %v542_v5  ;;  %v688_v16 = vld [vmem:[#allocation2 + $0x18] sm:$0xff] (!%p885_p2)  ;;  %708 = vst [vmem:[%s1790_s20] sm:$0xff] (!%p885_p2), %v700_v13 }
 0x285   : > { %680 = vst [vmem:[#allocation2 + $0x38] sm:$0xff] %v672_v7  ;;  %v687_v15 = vld [vmem:[#allocation2 + $0x10] sm:$0xff] (!%p885_p2)  ;;  %v703_v19 = vadd.f32 (!%p885_p2), %v886_v11, %v688_v16 }
 0x286   : > { %679 = vst [vmem:[#allocation2 + $0x30] sm:$0xff] %v671_v9  ;;  %v702_v18 = vadd.f32 (!%p885_p2), %v886_v11, %v687_v15 }
 0x287   : > { %711 = vst [vmem:[%s1790_s20 + $0x18] sm:$0xff] %v703_v19 }
 0x288   : > { %v690_v21 = vld [vmem:[#allocation2 + $0x28] sm:$0xff]  ;;  %710 = vst [vmem:[%s1790_s20 + $0x10] sm:$0xff] %v702_v18 }
 0x289   : > { %v689_v17 = vld [vmem:[#allocation2 + $0x20] sm:$0xff]  ;;  %v705_v24 = vadd.f32 %v886_v11, %v690_v21 }
 0x28a   : > { %v704_v20 = vadd.f32 %v886_v11, %v689_v17 }
 0x28b   : > { %713 = vst [vmem:[%s1790_s20 + $0x28] sm:$0xff] %v705_v24 }
 0x28c   : > { %v692_v23 = vld [vmem:[#allocation2 + $0x38] sm:$0xff]  ;;  %712 = vst [vmem:[%s1790_s20 + $0x20] sm:$0xff] %v704_v20 }
 0x28d   : > { %v691_v22 = vld [vmem:[#allocation2 + $0x30] sm:$0xff]  ;;  %v707_v26 = vadd.f32 %v886_v11, %v692_v23 }
 0x28e   : > { %v706_v25 = vadd.f32 %v886_v11, %v691_v22 }
 0x28f   : > { %715 = vst [vmem:[%s1790_s20 + $0x38] sm:$0xff] %v707_v26 }
 0x290   : > { %714 = vst [vmem:[%s1790_s20 + $0x30] sm:$0xff] %v706_v25 }
 0x291 PF: > { %s1975_s24 = sld [smem:[#allocation15_spill]]  ;;  %s730_s8 = sshll.u32 %s1790_s20, 4  ;;  %s1857_s8 = int_to_ptr.vmem [resolvable:$true] %s730_s8 }
 0x292   : > { %s1976_s6 = sld [smem:[#allocation23_spill]]  ;;  %s717_s23 = scalar_lea.sflag [#allocation5], %s1762_s1 }
 0x293   : > { %s1319_s4 = scalar_lea.vmem %s1857_s8, 1024  ;;  %p1977_p11 = scmp.ne.s32.totalorder %s1962_s14, 0 }
 0x294   : > { %p1320_p13 = scmp.ne.s32.totalorder %s1857_s8, %s1319_s4  ;;  %s1454_s15 = smov [#allocation9]  }
 0x295   : > { %s1323_s30 = sshll.u32 %s1454_s15, 4  ;;  %s1324_s30 = int_to_ptr.vmem [resolvable:$false] %s1323_s30 }
 0x296   : > { %p1321_p6 = pnand %p1320_p13, %p1977_p11  ;;  %s1325_s13 = scalar_lea.vmem %s1324_s30, 2048 }
 0x297   : > { %s894_s27 = sshll.u32 %s1975_s24, 10  ;;  %p1326_p1 = scmp.lt.s32.totalorder %s1857_s8, %s1324_s30 }
 0x298   : > { %s1854_s7 = scalar_lea.hbm %s1976_s6, %s894_s27  ;;  %p1322_p5 = pneg %p1321_p6 }
 0x299   : > { %p1327_p0 = scmp.lt.s32.totalorder %s1325_s13, %s1319_s4 }
 0x29b   : > { %p1328_p9 = por %p1327_p0, %p1326_p1 }
 0x29d   : > { %p1329_p12 = pnand %p1328_p9, %p1322_p5 }
 0x29f   : > { %1332 = shalt.err (!%p1329_p12)
}
 0x2a0   : > { %s1333_s12 = scalar_lea.hbm %s1854_s7, 1024  ;;  %s1337_s17 = scalar_lea.hbm %s1976_s6, 2048 }
 0x2a1   : > { %p1334_p3 = scmp.ne.s32.totalorder %s1854_s7, %s1333_s12  ;;  %p1338_p8 = scmp.lt.u32.totalorder %s1854_s7, %s1976_s6 }
 0x2a2   : > { %p1339_p10 = scmp.lt.u32.totalorder %s1337_s17, %s1333_s12  ;;  %p1341_p13 = scmp.lt.u32.totalorder %s1333_s12, %s1854_s7 }
 0x2a3   : > { %p1335_p4 = pnand %p1334_p3, %p1977_p11 }
 0x2a4   : > { %p1340_p2 = por %p1339_p10, %p1338_p8 }
 0x2a5   : > { %p1336_p7 = pneg %p1335_p4 }
 0x2a6   : > { %p1342_p6 = por %p1341_p13, %p1340_p2 }
 0x2a8   : > { %p1343_p5 = pnand %p1342_p6, %p1336_p7 }
 0x2aa   : > { %1346 = shalt.err (!%p1343_p5)
}
 0x2ab   : > { %s1455_s18 = smov 128   ;;  %s1456_s16 = smov 8  }
 0x2ac   : > { %1101 = dma.vmem_to_hbm [thread:$0]  (%p1977_p11), %s1857_s8, 1024, %s1854_s7, %s717_s23, %s1455_s18, %s1455_s18, %s1456_s16  }
 0x2ad PF: > { %p1118_p1 = scmp.ge.s32.totalorder %s1445_s28, 2  ;;  %s745_s24 = sand.u32 1, %s1417_s21  }
 0x2ae   : > { %p1978_p0 = scmp.ne.s32.totalorder %s1964_s5, 0  ;;  %s746_s27 = scalar_lea.sflag [#allocation5], %s745_s24 }
 0x2b0   : > { %p1114_p9 = pnand %p1118_p1, %p1978_p0 }
 0x2b2   : > { %1400 = dma.done.wait (!%p1114_p9), %s746_s27, 1024  }
 0x2b3   : > { %1402 = vsyncadd (!%p1114_p9), %s746_s27, 4294966272  ;;  %s24_s28 = sadd.s32 1, %s1445_s28   ;;  %s1979_s11 = sld [smem:[#allocation13_spill]] }
 0x2b4   : > { %p21_p12 = scmp.ge.s32.totalorder %s24_s28, 6   ;;  %s1980_s20 = sld [smem:[#allocation18_spill]] }
 0x2b5   : > { %s1981_s14 = sld [smem:[#allocation14_spill]]  ;;  %s1982_s23 = sld [smem:[#allocation20_spill]] }
 0x2b6   : > { %s1983_s25 = sld [smem:[#allocation16_spill]]  ;;  %s1984_s1 = sld [smem:[#allocation17_spill]] }
 0x2b7   : > { %s1985_s27 = sld [smem:[#allocation19_spill]]  ;;  %s1986_s18 = smov %s1409_s19 }
 0x2b8   : > { %s1988_s21 = smov %s1421_s22  ;;  %s1990_s24 = smov %s1437_s26 }
 0x2b9   : > { %s1987_s19 = smov %s1979_s11  ;;  %23 = sbr.rel (!%p21_p12) target bundleno = 15 (0xf), region = 120 }
 0x2bb   : > { %s1989_s22 = smov %s1981_s14 }
 0x2bc   : > { %s1991_s26 = smov %s1984_s1 }
 0x2c0   :  { %751 = vsyncpa [#allocation4], 1 }
 0x2c1   :  { %753 = vsyncpa [#allocation4 + $0x1], 1 }
 0x2c2   :  { %754 = vsyncpa [#allocation7], 1 }
 0x2c3   :  { %756 = vsyncpa [#allocation7 + $0x1], 1 }
 0x2c4   :  { %757 = vsyncpa [#allocation5], 1 }
 0x2c5   :  { %759 = vsyncpa [#allocation5 + $0x1], 1 }

</bundles_post_ra>
